<compile_context>
chip_gen: v5e
topology: v5e:2x2
jax: 0.10.0
libtpu: 0.0.40
codegen_flags: <defaults>
</compile_context>

<pallas_src>
import functools

import jax
import jax.numpy as jnp
from jax.experimental import pallas as pl
from jax.experimental.pallas import tpu as pltpu

_LANES = 128


def _clip_kernel(x_ref, o_ref, *, min_val, max_val):
    x = x_ref[...]
    lo = jnp.asarray(min_val, x_ref.dtype)
    hi = jnp.asarray(max_val, x_ref.dtype)
    # max-then-min matches torch.clip semantics (incl. min > max and NaN prop)
    o_ref[...] = jnp.minimum(jnp.maximum(x, lo), hi)


def _sublane_for(dtype) -> int:
    itemsize = jnp.dtype(dtype).itemsize
    return {4: 8, 2: 16, 1: 32}.get(itemsize, 8)


def _device_defaults():
    """Per-generation (target_block_bytes, has_two_tensorcores)."""
    try:
        kind = jax.devices()[0].device_kind.lower()
    except Exception:
        kind = ""
    if "v7" in kind:
        return 6 * 1024 * 1024, True
    if "v6" in kind:
        return 8 * 1024 * 1024, False
    if "v5" in kind:
        return 2 * 1024 * 1024, False
    return 4 * 1024 * 1024, False


def clip_layer(x, min_val=-1.0, max_val=1.0, *,
               target_block_bytes=None,
               donate_input=False,
               small_bypass_bytes=1 << 20):
    """Pallas implementation of ClipLayer.forward.

    x: any-shape array (e.g. NCHW). Returns an array of the same shape/dtype
    with values clamped to [min_val, max_val].

    donate_input: only set True when the caller donates / no longer needs x;
    then the clip runs in place on the input buffer.
    """
    orig_shape = x.shape
    dtype = x.dtype
    itemsize = jnp.dtype(dtype).itemsize
    total = x.size
    nbytes = total * itemsize

    default_block, two_cores = _device_defaults()
    if target_block_bytes is None:
        target_block_bytes = default_block

    # Tiny inputs (launch/pipeline overhead dominates) and ragged sizes that
    # are not lane-divisible: plain XLA clip streams at roofline, fuses with
    # neighbors, and avoids any pad/slice extra HBM passes.
    if total == 0 or nbytes < small_bypass_bytes or (total % _LANES) != 0:
        return jnp.clip(x, min_val, max_val)

    sublane = _sublane_for(dtype)
    rows = total // _LANES
    rows_rounded = ((rows + sublane - 1) // sublane) * sublane

    # Large lane-dense block (~target_block_bytes) for near-roofline HBM use.
    tile_rows = (target_block_bytes // (_LANES * itemsize)) // sublane * sublane
    tile_rows = max(sublane, min(tile_rows, rows_rounded))

    n_blocks = -(-rows // tile_rows)
    if two_cores and (n_blocks % 2 == 1) and rows > sublane:
        # v7x: keep both TensorCores busy and balanced under "parallel".
        tr = -(-rows // (n_blocks + 1))
        tr = max(sublane, ((tr + sublane - 1) // sublane) * sublane)
        if -(-rows // tr) >= 2:
            tile_rows = tr
            n_blocks = -(-rows // tile_rows)

    grid = (n_blocks,)
    x2d = x.reshape(rows, _LANES)
    io_aliases = {0: 0} if donate_input else {}

    # Double-buffered in + out = 4 x block; 6x gives headroom, cap at 48 MiB
    # (safe on every generation; v7x physical VMEM is 64 MiB per TC).
    block_bytes = tile_rows * _LANES * itemsize
    vmem_limit = int(min(48 << 20, max(16 << 20, 6 * block_bytes)))

    kernel = functools.partial(_clip_kernel,
                               min_val=float(min_val), max_val=float(max_val))

    out2d = pl.pallas_call(
        kernel,
        out_shape=jax.ShapeDtypeStruct((rows, _LANES), dtype),
        grid_spec=pltpu.PrefetchScalarGridSpec(
            num_scalar_prefetch=0,
            grid=grid,
            in_specs=[pl.BlockSpec((tile_rows, _LANES), lambda i: (i, 0))],
            out_specs=pl.BlockSpec((tile_rows, _LANES), lambda i: (i, 0)),
        ),
        compiler_params=pltpu.CompilerParams(
            dimension_semantics=("parallel",),
            vmem_limit_bytes=vmem_limit),
        cost_estimate=pl.CostEstimate(
            flops=2 * total, transcendentals=0, bytes_accessed=2 * nbytes),
        input_output_aliases=io_aliases,
    )(x2d)

    return out2d.reshape(orig_shape)


if __name__ == "__main__":
    key = jax.random.PRNGKey(0)
    k1, k2, k3, k4 = jax.random.split(key, 4)

    # 1) f32 NCHW demo shape; force the Pallas path (bypass threshold off so
    #    the small demo tensor actually exercises the kernel).
    x = jax.random.normal(k1, (2, 4, 16, 16), dtype=jnp.float32) * 3.0
    y = jax.block_until_ready(clip_layer(x, -1.0, 1.0, small_bypass_bytes=0))
    y_ref = jnp.minimum(jnp.maximum(x, -1.0), 1.0)
    assert y.shape == x.shape and y.dtype == x.dtype
    assert bool(jnp.allclose(y, y_ref)), "mismatch vs reference clip (f32)"

    # 2) bf16 through the Pallas path (16-row sublane granularity).
    x_bf = (jax.random.normal(k2, (2, 4, 16, 16), jnp.float32) * 3.0
            ).astype(jnp.bfloat16)
    y_bf = jax.block_until_ready(
        clip_layer(x_bf, -1.0, 1.0, small_bypass_bytes=0))
    ref_bf = jnp.minimum(jnp.maximum(x_bf.astype(jnp.float32), -1.0), 1.0)
    assert y_bf.dtype == jnp.bfloat16 and y_bf.shape == x_bf.shape
    assert bool(jnp.allclose(y_bf.astype(jnp.float32), ref_bf)), \
        "mismatch vs reference clip (bf16)"

    # 3) Opt-in in-place aliasing path (XLA copies defensively here since the
    #    buffer is still live, so results stay correct either way).
    x_d = jax.random.normal(k3, (2, 4, 16, 16), dtype=jnp.float32) * 3.0
    y_d = jax.block_until_ready(
        clip_layer(x_d, -1.0, 1.0, small_bypass_bytes=0, donate_input=True))
    assert bool(jnp.allclose(y_d, jnp.minimum(jnp.maximum(x_d, -1.0), 1.0))), \
        "mismatch vs reference clip (donated path)"

    # 4) Ragged (size not divisible by 128) and tiny inputs use the XLA
    #    fallback — no pad/slice HBM round trips.
    x_r = jax.random.normal(k4, (3, 5, 7), dtype=jnp.float32) * 3.0
    y_r = jax.block_until_ready(clip_layer(x_r, -1.0, 1.0))
    assert y_r.shape == x_r.shape
    assert bool(jnp.allclose(y_r, jnp.clip(x_r, -1.0, 1.0))), \
        "mismatch vs reference clip (ragged fallback)"

    print("KERNEL_OK")
</pallas_src>

<mosaic_0001>
module attributes {stable_mosaic.version = 11 : i64} {
  func.func @_clip_kernel(%arg0: i32, %arg1: memref<16x128xf32, #tpu.memory_space<vmem>>, %arg2: memref<16x128xf32, #tpu.memory_space<vmem>>) attributes {dimension_semantics = [#tpu.dimension_semantics<parallel>], iteration_bounds = array<i64: 1>, scalar_prefetch = 0 : i64, scratch_operands = 0 : i64, tpu.core_type = #tpu.core_type<tc>, window_params = [{transform_indices = @transform_0, window_bounds = array<i64: 16, 128>}, {transform_indices = @transform_1, window_bounds = array<i64: 16, 128>}]} {
    %c0 = arith.constant 0 : index
    %c0_0 = arith.constant 0 : index
    %0 = vector.load %arg1[%c0, %c0_0] : memref<16x128xf32, #tpu.memory_space<vmem>>, vector<16x128xf32>
    %cst = arith.constant -1.000000e+00 : f32
    %1 = vector.broadcast %cst : f32 to vector<16x128xf32>
    %2 = arith.maximumf %0, %1 : vector<16x128xf32>
    %cst_1 = arith.constant 1.000000e+00 : f32
    %3 = vector.broadcast %cst_1 : f32 to vector<16x128xf32>
    %4 = arith.minimumf %2, %3 : vector<16x128xf32>
    %c0_2 = arith.constant 0 : index
    %c0_3 = arith.constant 0 : index
    %5 = vector.load %arg2[%c0_2, %c0_3] : memref<16x128xf32, #tpu.memory_space<vmem>>, vector<16x128xf32>
    tpu.vector_store %arg2[%c0_2, %c0_3], %4 {strides = array<i32>} : memref<16x128xf32, #tpu.memory_space<vmem>>, vector<16x128xf32>,
    return
  }
  func.func @transform_0(%arg0: i32) -> (i32, i32) {
    %c0_i32 = arith.constant 0 : i32
    %c0_i32_0 = arith.constant 0 : i32
    return %arg0, %c0_i32 : i32, i32
  }
  func.func @transform_1(%arg0: i32) -> (i32, i32) {
    %c0_i32 = arith.constant 0 : i32
    %c0_i32_0 = arith.constant 0 : i32
    return %arg0, %c0_i32 : i32, i32
  }
}

</mosaic_0001>

<bundles_post_ra>
// kernel: tpu_custom_call.1
= control target key start
LH: loop header
LB: loop body
LE: loop exit
PB: predicated region body
PF: predicated region fallthrough
CT: control target
= control target key end

     0   :  { %6 = vsyncpa [#allocation3], 0  ;;  %s130_s0 = inlined_call_operand.hbm [shape: f32[16,128], index: 0, kind: input, shape index: {}]   ;;  %s131_s1 = inlined_call_operand.hbm [shape: f32[16,128], index: 1, kind: output, shape index: {}]  }
   0x1   :  { %7 = vsyncpa [#allocation4], 0  ;;  %s12_s8 = sshll.u32 %s130_s0, 4  ;;  %s110_s9 = smov [#allocation2]   ;;  %s13_s8 = int_to_ptr.hbm [resolvable:$true] %s12_s8 }
   0x2   :  { %s14_s10 = sshll.u32 %s110_s9, 4  ;;  %s111_s11 = smov 128   ;;  %s15_s10 = int_to_ptr.vmem [resolvable:$true] %s14_s10 }
   0x3   :  { %s112_s12 = smov 8  }
   0x4   :  { %20 = dma.hbm_to_vmem [thread:$0]  %s13_s8, 256, %s15_s10, [#allocation3], %s111_s11, %s111_s11, %s112_s12  }
   0x5   :  { %106 = dma.done.wait [#allocation3], 256  }
   0x6   :  { %107 = vsyncadd [#allocation3], 4294967040  ;;  %s113_s13 = smov [#allocation5]   ;;  %s39_s17 = sshll.u32 %s131_s1, 4  ;;  %v25_v0 = vld [vmem:[#allocation2] sm:$0xff]  ;;  %v26_v1 = vld [vmem:[#allocation2 + $0x8] sm:$0xff]  ;;  %s40_s17 = int_to_ptr.hbm [resolvable:$true] %s39_s17 }
   0x7   :  { %s37_s14 = sshll.u32 %s113_s13, 4  ;;  %v52_v2 = vclamps-f32 %v25_v0, 1.0  ;;  %v53_v3 = vclamps-f32 %v26_v1, 1.0  ;;  %s38_s14 = int_to_ptr.vmem [resolvable:$true] %s37_s14 }
   0x9   :  { %31 = vst [vmem:[#allocation5] sm:$0xff] %v52_v2 }
   0xa   :  { %32 = vst [vmem:[#allocation5 + $0x8] sm:$0xff] %v53_v3 }
   0xb   :  { %45 = dma.vmem_to_hbm [thread:$0]  %s38_s14, 256, %s40_s17, [#allocation4], %s111_s11, %s111_s11, %s112_s12  }
   0xc   :  { %108 = dma.done.wait [#allocation4], 256  }
   0xd   :  { %109 = vsyncadd [#allocation4], 4294967040 }
   0xe   :  { %50 = vsyncpa [#allocation3], 1 }
   0xf   :  { %51 = vsyncpa [#allocation4], 1 }

</bundles_post_ra>
